<compile_context>
chip_gen: v6e
topology: v6e:2x2x1
jax: 0.10.0
libtpu: 0.0.40
codegen_flags: <defaults>
</compile_context>

<pallas_src>
import functools

import numpy as np
import jax
import jax.numpy as jnp
from jax.experimental import pallas as pl
from jax.experimental.pallas import tpu as pltpu


# ---------------------------------------------------------------------------
# Static helpers (trace-time / numpy only)
# ---------------------------------------------------------------------------
def _nearest_indices(in_size: int, out_size: int) -> np.ndarray:
    """PyTorch F.interpolate(mode='nearest') index rule: src = floor(dst * in/out)."""
    idx = np.floor(np.arange(out_size) * (in_size / out_size)).astype(np.int64)
    return np.clip(idx, 0, in_size - 1)


def _selection_matrix(h: int, w: int, sz: int, dtype) -> np.ndarray:
    """(h*w, sz*sz) 0/1 matrix so that x_flat @ S == nearest_resize(x, (sz, sz)).flatten."""
    idx_h = _nearest_indices(h, sz)
    idx_w = _nearest_indices(w, sz)
    src = (idx_h[:, None] * w + idx_w[None, :]).reshape(-1)  # (sz*sz,) source flat idx
    s = np.zeros((h * w, sz * sz), dtype=dtype)
    s[src, np.arange(sz * sz)] = 1
    return s


# ---------------------------------------------------------------------------
# Kernel: for one batch element, resize every source via MXU selection matmul
# (or plain copy when it is already at the target size) and place it in its
# channel slice of the lane-dense output slab.
# ---------------------------------------------------------------------------
def _scaffold_kernel(n_src, chans, needs_resize, *refs):
    # refs layout: for each source i -> x_i, then S_i only if needs_resize[i];
    # last ref is the output.
    #   x_i : (C_i, H_i*W_i)   VMEM block (batch dim squeezed)
    #   S_i : (H_i*W_i, sz*sz) static 0/1 selection matrix
    #   o   : (C_total, sz*sz)
    o_ref = refs[-1]
    c_off = 0
    r = 0
    for i in range(n_src):
        x_ref = refs[r]
        r += 1
        if needs_resize[i]:
            s_ref = refs[r]
            r += 1
            y = jnp.dot(x_ref[...], s_ref[...], preferred_element_type=jnp.float32)
            o_ref[c_off:c_off + chans[i], :] = y.astype(o_ref.dtype)
        else:
            # Source is already at (sz, sz): pure channel-slice copy, no MXU work.
            o_ref[c_off:c_off + chans[i], :] = x_ref[...].astype(o_ref.dtype)
        c_off += chans[i]


# ---------------------------------------------------------------------------
# Wrapper: full Scaffold.forward
# ---------------------------------------------------------------------------
def scaffold_forward(x, ops):
    """Equivalent of Scaffold(*ops).forward(x) for NCHW x; `ops` are JAX callables."""
    assert len(ops) >= 1, "Scaffold needs at least one op"

    # 1) sequential op application (outside the kernel; arbitrary user callables)
    outs = []
    t = x
    for op in ops:
        t = op(t)
        outs.append(t)

    # 2) fused nearest-resize-to-min + channel-concat Pallas kernel
    sz = min(int(o.shape[-1]) for o in outs)
    P = sz * sz
    B = int(outs[0].shape[0])
    dtype = outs[0].dtype
    itemsize = jnp.dtype(dtype).itemsize

    flats, sels, chans, needs_resize = [], [], [], []
    for o in outs:
        _, C, H, W = (int(d) for d in o.shape)
        flats.append(o.reshape(B, C, H * W))
        chans.append(C)
        if (H, W) == (sz, sz):
            needs_resize.append(False)
            sels.append(None)
        else:
            needs_resize.append(True)
            sels.append(jnp.asarray(_selection_matrix(H, W, sz, np.dtype(dtype))))
    c_total = sum(chans)

    in_specs, args = [], []
    for f, s, nr in zip(flats, sels, needs_resize):
        C_i, HW_i = int(f.shape[1]), int(f.shape[2])
        # full-extent blocks per batch element (small shapes; fits VMEM easily)
        in_specs.append(pl.BlockSpec((None, C_i, HW_i), lambda b: (b, 0, 0)))
        args.append(f)
        if nr:
            in_specs.append(pl.BlockSpec((HW_i, P), lambda b: (0, 0)))
            args.append(s)

    flops = 2 * B * sum(
        int(f.shape[1]) * int(f.shape[2]) * P
        for f, nr in zip(flats, needs_resize) if nr
    )
    bytes_accessed = (
        B * sum(int(f.shape[1]) * int(f.shape[2]) for f in flats) * itemsize
        + sum(int(s.size) for s in sels if s is not None) * itemsize
        + B * c_total * P * itemsize
    )

    out = pl.pallas_call(
        functools.partial(
            _scaffold_kernel, len(outs), tuple(chans), tuple(needs_resize)
        ),
        out_shape=jax.ShapeDtypeStruct((B, c_total, P), dtype),
        grid_spec=pltpu.PrefetchScalarGridSpec(
            num_scalar_prefetch=0,
            grid=(B,),
            in_specs=in_specs,
            out_specs=pl.BlockSpec((None, c_total, P), lambda b: (b, 0, 0)),
        ),
        compiler_params=pltpu.CompilerParams(
            dimension_semantics=("parallel",),
        ),
        cost_estimate=pl.CostEstimate(
            flops=flops, transcendentals=0, bytes_accessed=bytes_accessed
        ),
    )(*args)

    # (B, C_total, sz*sz) -> (B, C_total, sz, sz): contiguous, free
    return out.reshape(B, c_total, sz, sz)


# ---------------------------------------------------------------------------
# Demo / self-check
# ---------------------------------------------------------------------------
def avg_pool2x2(a):
    """Example 'op' (pure JAX): 2x2 average pooling, stride 2."""
    B, C, H, W = a.shape
    return a.reshape(B, C, H // 2, 2, W // 2, 2).mean(axis=(3, 5))


def scale_op(a):
    """Example 'op' (pure JAX): pointwise scale, keeps spatial size."""
    return 0.5 * a + 1.0


if __name__ == "__main__":
    key = jax.random.PRNGKey(0)
    B, C, H, W = 2, 4, 16, 16
    x = jax.random.normal(key, (B, C, H, W), dtype=jnp.float32)

    # Produces 8x8, 8x8, 4x4 intermediates -> min size 4 (two resized, one copied).
    ops = (avg_pool2x2, scale_op, avg_pool2x2)
    y = jax.block_until_ready(scaffold_forward(x, ops))

    # Pure-JAX reference mirroring PyTorch Scaffold semantics exactly.
    outs = []
    t = x
    for op in ops:
        t = op(t)
        outs.append(t)
    sz = min(int(o.shape[-1]) for o in outs)

    def nearest_resize_ref(a, size):
        _, _, h, w = a.shape
        ih = _nearest_indices(h, size)
        iw = _nearest_indices(w, size)
        return a[:, :, ih, :][:, :, :, iw]

    ref = jnp.concatenate([nearest_resize_ref(o, sz) for o in outs], axis=1)

    assert y.shape == ref.shape, (y.shape, ref.shape)
    assert y.dtype == x.dtype
    assert jnp.allclose(y, ref, atol=1e-5, rtol=1e-5), float(jnp.max(jnp.abs(y - ref)))

    print("KERNEL_OK")
</pallas_src>

<mosaic_0001>
module attributes {stable_mosaic.version = 11 : i64} {
  func.func @_scaffold_kernel(%arg0: i32, %arg1: memref<1x4x64xf32, #tpu.memory_space<vmem>>, %arg2: memref<64x16xf32, #tpu.memory_space<vmem>>, %arg3: memref<1x4x64xf32, #tpu.memory_space<vmem>>, %arg4: memref<64x16xf32, #tpu.memory_space<vmem>>, %arg5: memref<1x4x16xf32, #tpu.memory_space<vmem>>, %arg6: memref<1x12x16xf32, #tpu.memory_space<vmem>>) attributes {dimension_semantics = [#tpu.dimension_semantics<parallel>], iteration_bounds = array<i64: 2>, scalar_prefetch = 0 : i64, scratch_operands = 0 : i64, tpu.core_type = #tpu.core_type<tc>, window_params = [{transform_indices = @transform_0, window_bounds = array<i64: 1, 4, 64>}, {pipeline_mode = #tpu.pipeline_mode<synchronous>, transform_indices = @transform_1, window_bounds = array<i64: 64, 16>}, {transform_indices = @transform_2, window_bounds = array<i64: 1, 4, 64>}, {pipeline_mode = #tpu.pipeline_mode<synchronous>, transform_indices = @transform_3, window_bounds = array<i64: 64, 16>}, {transform_indices = @transform_4, window_bounds = array<i64: 1, 4, 16>}, {transform_indices = @transform_5, window_bounds = array<i64: 1, 12, 16>}]} {
    %c0 = arith.constant 0 : index
    %c0_0 = arith.constant 0 : index
    %c0_1 = arith.constant 0 : index
    %0 = vector.load %arg1[%c0, %c0_0, %c0_1] : memref<1x4x64xf32, #tpu.memory_space<vmem>>, vector<1x4x64xf32>
    %1 = vector.shape_cast %0 : vector<1x4x64xf32> to vector<4x64xf32>
    %c0_2 = arith.constant 0 : index
    %c0_3 = arith.constant 0 : index
    %2 = vector.load %arg2[%c0_2, %c0_3] : memref<64x16xf32, #tpu.memory_space<vmem>>, vector<64x16xf32>
    %cst = arith.constant dense<0.000000e+00> : vector<4x16xf32>
    %3 = tpu.matmul %1, %2, %cst {dimension_numbers = #tpu.dot_dimension_numbers<[1], [0], [0], [1], [0, 0, 1, 1], [], []>} : vector<4x64xf32>, vector<64x16xf32>, vector<4x16xf32> -> vector<4x16xf32>
    %c0_4 = arith.constant 0 : index
    %c0_5 = arith.constant 0 : index
    %c0_6 = arith.constant 0 : index
    %4 = vector.load %arg6[%c0_4, %c0_5, %c0_6] : memref<1x12x16xf32, #tpu.memory_space<vmem>>, vector<1x4x16xf32>
    %5 = vector.shape_cast %4 : vector<1x4x16xf32> to vector<4x16xf32>
    %6 = vector.shape_cast %3 : vector<4x16xf32> to vector<1x4x16xf32>
    tpu.vector_store %arg6[%c0_4, %c0_5, %c0_6], %6 {strides = array<i32>} : memref<1x12x16xf32, #tpu.memory_space<vmem>>, vector<1x4x16xf32>,
    %c0_7 = arith.constant 0 : index
    %c0_8 = arith.constant 0 : index
    %c0_9 = arith.constant 0 : index
    %7 = vector.load %arg3[%c0_7, %c0_8, %c0_9] : memref<1x4x64xf32, #tpu.memory_space<vmem>>, vector<1x4x64xf32>
    %8 = vector.shape_cast %7 : vector<1x4x64xf32> to vector<4x64xf32>
    %c0_10 = arith.constant 0 : index
    %c0_11 = arith.constant 0 : index
    %9 = vector.load %arg4[%c0_10, %c0_11] : memref<64x16xf32, #tpu.memory_space<vmem>>, vector<64x16xf32>
    %cst_12 = arith.constant dense<0.000000e+00> : vector<4x16xf32>
    %10 = tpu.matmul %8, %9, %cst_12 {dimension_numbers = #tpu.dot_dimension_numbers<[1], [0], [0], [1], [0, 0, 1, 1], [], []>} : vector<4x64xf32>, vector<64x16xf32>, vector<4x16xf32> -> vector<4x16xf32>
    %c0_13 = arith.constant 0 : index
    %c4 = arith.constant 4 : index
    %c0_14 = arith.constant 0 : index
    %11 = vector.load %arg6[%c0_13, %c4, %c0_14] : memref<1x12x16xf32, #tpu.memory_space<vmem>>, vector<1x4x16xf32>
    %12 = vector.shape_cast %11 : vector<1x4x16xf32> to vector<4x16xf32>
    %13 = vector.shape_cast %10 : vector<4x16xf32> to vector<1x4x16xf32>
    tpu.vector_store %arg6[%c0_13, %c4, %c0_14], %13 {strides = array<i32>} : memref<1x12x16xf32, #tpu.memory_space<vmem>>, vector<1x4x16xf32>,
    %c0_15 = arith.constant 0 : index
    %c0_16 = arith.constant 0 : index
    %c0_17 = arith.constant 0 : index
    %14 = vector.load %arg5[%c0_15, %c0_16, %c0_17] : memref<1x4x16xf32, #tpu.memory_space<vmem>>, vector<1x4x16xf32>
    %15 = vector.shape_cast %14 : vector<1x4x16xf32> to vector<4x16xf32>
    %c0_18 = arith.constant 0 : index
    %c8 = arith.constant 8 : index
    %c0_19 = arith.constant 0 : index
    %16 = vector.load %arg6[%c0_18, %c8, %c0_19] : memref<1x12x16xf32, #tpu.memory_space<vmem>>, vector<1x4x16xf32>
    %17 = vector.shape_cast %16 : vector<1x4x16xf32> to vector<4x16xf32>
    %18 = vector.shape_cast %15 : vector<4x16xf32> to vector<1x4x16xf32>
    tpu.vector_store %arg6[%c0_18, %c8, %c0_19], %18 {strides = array<i32>} : memref<1x12x16xf32, #tpu.memory_space<vmem>>, vector<1x4x16xf32>,
    return
  }
  func.func @transform_0(%arg0: i32) -> (i32, i32, i32) {
    %c0_i32 = arith.constant 0 : i32
    %c0_i32_0 = arith.constant 0 : i32
    %c0_i32_1 = arith.constant 0 : i32
    return %arg0, %c0_i32, %c0_i32_0 : i32, i32, i32
  }
  func.func @transform_1(%arg0: i32) -> (i32, i32) {
    %c0_i32 = arith.constant 0 : i32
    %c0_i32_0 = arith.constant 0 : i32
    %c0_i32_1 = arith.constant 0 : i32
    return %c0_i32, %c0_i32_0 : i32, i32
  }
  func.func @transform_2(%arg0: i32) -> (i32, i32, i32) {
    %c0_i32 = arith.constant 0 : i32
    %c0_i32_0 = arith.constant 0 : i32
    %c0_i32_1 = arith.constant 0 : i32
    return %arg0, %c0_i32, %c0_i32_0 : i32, i32, i32
  }
  func.func @transform_3(%arg0: i32) -> (i32, i32) {
    %c0_i32 = arith.constant 0 : i32
    %c0_i32_0 = arith.constant 0 : i32
    %c0_i32_1 = arith.constant 0 : i32
    return %c0_i32, %c0_i32_0 : i32, i32
  }
  func.func @transform_4(%arg0: i32) -> (i32, i32, i32) {
    %c0_i32 = arith.constant 0 : i32
    %c0_i32_0 = arith.constant 0 : i32
    %c0_i32_1 = arith.constant 0 : i32
    return %arg0, %c0_i32, %c0_i32_0 : i32, i32, i32
  }
  func.func @transform_5(%arg0: i32) -> (i32, i32, i32) {
    %c0_i32 = arith.constant 0 : i32
    %c0_i32_0 = arith.constant 0 : i32
    %c0_i32_1 = arith.constant 0 : i32
    return %arg0, %c0_i32, %c0_i32_0 : i32, i32, i32
  }
}

</mosaic_0001>

<bundles_post_ra>
// kernel: tpu_custom_call.1
= control target key start
LH: loop header
LB: loop body
LE: loop exit
PB: predicated region body
PF: predicated region fallthrough
CT: control target
= control target key end

     0   :  { %s626_s18 = smov 0   ;;  %s706_s0 = inlined_call_operand.vmem [shape: f32[2,4,64], index: 0, kind: input, shape index: {}]   ;;  %s707_s1 = inlined_call_operand.vmem [shape: f32[64,16], index: 1, kind: input, shape index: {}]   ;;  %s708_s2 = inlined_call_operand.vmem [shape: f32[2,4,64], index: 2, kind: input, shape index: {}]   ;;  %s709_s3 = inlined_call_operand.vmem [shape: f32[64,16], index: 3, kind: input, shape index: {}]   ;;  %s710_s4 = inlined_call_operand.vmem [shape: f32[2,4,16], index: 4, kind: input, shape index: {}]   ;;  %s711_s5 = inlined_call_operand.vmem [shape: f32[2,12,16], index: 5, kind: output, shape index: {}]  }
   0x1 LB: > { %s505_s19 = sadd.s32 4294967295, %s592_s18   ;;  %p509_p0 = scmp.ge.s32.totalorder %s592_s18, 1  ;;  %s592_s18 = sphi %s626_s18, %s15_s18  }
   0x2   : > { %p204_p1 = scmp.lt.s32.totalorder %s592_s18, 3 }
   0x4   : > { %p205_p2 = pnand %p509_p0, %p204_p1 }
   0x5   : > { %p239_p3 = scmp.lt.s32.totalorder (!%p205_p2), %s505_s19, 1 }
   0x6   : > { %208 = sbr.rel (%p205_p2) target bundleno = 224 (0xe0), region = 40 }
   0xb   : > { %v264_v0 = vld [vmem:[%s707_s1 + $0x38] sm:$0xff]  ;;  %v594_v2 = vmov 0.0   ;;  %v263_v3 = vld [vmem:[%s707_s1 + $0x30] sm:$0xff]  ;;  %v262_v5 = vld [vmem:[%s707_s1 + $0x28] sm:$0xff]  ;;  %s713_s19 = smov (!%p239_p3, %s505_s19), 1  ;;  %vm265_vm0 = vcmask 523264  }
   0xc   : > { %v349_v1 = vld [vmem:[%s709_s3 + $0x38] sm:$0xff]  ;;  %538 = vmatprep.subr.mxu0 %v594_v2  ;;  %557 = vmatprep.subr.mxu1 %v594_v2  ;;  %v348_v4 = vld [vmem:[%s709_s3 + $0x30] sm:$0xff]  ;;  %v347_v6 = vld [vmem:[%s709_s3 + $0x28] sm:$0xff]  ;;  %s673_s21 = sshll.u32 %s713_s19, 2  ;;  %vm595_vm1 = vmmov 0   ;;  %s519_s11 = sshll.u32 %s713_s19, 4 }
   0xd   : > { %539 = vmatpush3.msra.mxu0 %v264_v0  ;;  %558 = vmatpush3.msra.mxu1 %v349_v1  ;;  %v261_v7 = vld [vmem:[%s707_s1 + $0x20] sm:$0xff]  ;;  %v260_v9 = vld [vmem:[%s707_s1 + $0x18] sm:$0xff]  ;;  %v259_v11 = vld [vmem:[%s707_s1 + $0x10] sm:$0xff]  ;;  %s242_s28 = scalar_lea.vmem %s706_s0, %s673_s21  ;;  %s246_s6 = scalar_lea.vmem %s708_s2, %s673_s21  ;;  %vm339_vm2 = vcmask 125952  }
   0xe   : > { %540 = vmatprep.subr.mxu0 %v594_v2  ;;  %559 = vmatprep.subr.mxu1 %v594_v2  ;;  %v346_v8 = vld [vmem:[%s709_s3 + $0x20] sm:$0xff]  ;;  %v345_v10 = vld [vmem:[%s709_s3 + $0x18] sm:$0xff]  ;;  %v344_v12 = vld [vmem:[%s709_s3 + $0x10] sm:$0xff]  ;;  %s250_s14 = scalar_lea.vmem %s710_s4, %s673_s21  ;;  %s255_s17 = scalar_lea.vmem %s711_s5, %s519_s11 }
   0xf   : > { %541 = vmatpush3.msra.mxu0 %v263_v3  ;;  %560 = vmatpush3.msra.mxu1 %v348_v4  ;;  %v258_v13 = vld [vmem:[%s707_s1 + $0x8] sm:$0xff]  ;;  %v257_v15 = vld [vmem:[%s707_s1] sm:$0xff] }
  0x10   : > { %542 = vmatprep.subr.mxu0 %v594_v2  ;;  %561 = vmatprep.subr.mxu1 %v594_v2  ;;  %v343_v14 = vld [vmem:[%s709_s3 + $0x8] sm:$0xff]  ;;  %v342_v16 = vld [vmem:[%s709_s3] sm:$0xff] }
  0x11   : > { %543 = vmatpush3.msra.mxu0 %v262_v5  ;;  %562 = vmatpush3.msra.mxu1 %v347_v6  ;;  %v256_v17 = vld [vmem:[%s242_s28] sm:$0xf] }
  0x12   : > { %544 = vmatprep.subr.mxu0 %v594_v2  ;;  %563 = vmatprep.subr.mxu1 %v594_v2  ;;  %v341_v18 = vld [vmem:[%s246_s6] sm:$0xf] }
  0x13   : > { %545 = vmatpush3.msra.mxu0 %v261_v7  ;;  %564 = vmatpush3.msra.mxu1 %v346_v8  ;;  %v424_v19 = vld [vmem:[%s250_s14] sm:$0xf] }
  0x14   : > { %546 = vmatprep.subr.mxu0 %v594_v2  ;;  %565 = vmatprep.subr.mxu1 %v594_v2  ;;  %425 = vst.msk [vmem:[%s255_s17 + $0x8] sm:$0xf] %vm339_vm2, %v424_v19 }
  0x15   : > { %547 = vmatpush3.msra.mxu0 %v260_v9  ;;  %566 = vmatpush3.msra.mxu1 %v345_v10 }
  0x16   : > { %548 = vmatprep.subr.mxu0 %v594_v2  ;;  %567 = vmatprep.subr.mxu1 %v594_v2 }
  0x17   : > { %549 = vmatpush3.msra.mxu0 %v259_v11  ;;  %568 = vmatpush3.msra.mxu1 %v344_v12 }
  0x18   : > { %550 = vmatprep.subr.mxu0 %v594_v2  ;;  %569 = vmatprep.subr.mxu1 %v594_v2 }
  0x19   : > { %551 = vmatpush3.msra.mxu0 %v258_v13  ;;  %570 = vmatpush3.msra.mxu1 %v343_v14 }
  0x1a   : > { %552 = vmatprep.subr.mxu0 %v594_v2  ;;  %571 = vmatprep.subr.mxu1 %v594_v2 }
  0x1b   : > { %553 = vmatpush3.msra.mxu0 %v257_v15  ;;  %554 = vmatprep.mubr.msk.f32.mxu0 %vm595_vm1, %v594_v2 }
  0x1c   : > { %572 = vmatpush3.msra.mxu1 %v342_v16  ;;  %573 = vmatprep.mubr.msk.f32.mxu1 %vm595_vm1, %v594_v2 }
  0x1d   : > { %555 = vmatmul.mubr.msk.f32.vlgmr.msra.gmra.mxu0 %vm265_vm0, %v256_v17  ;;  %574 = vmatmul.mubr.msk.f32.vlgmr.msra.gmra.mxu1 %vm265_vm0, %v341_v18 }
  0xdd   : > { %v335_v20 = vpop.f32.mrf.mxu0  ;;  %v419_v21 = vpop.f32.mrf.mxu1 }
  0xde   : > { %340 = vst.msk [vmem:[%s255_s17] sm:$0xf] %vm339_vm2, %v335_v20  ;;  %423 = vst.msk [vmem:[%s255_s17 + $0x4] sm:$0xf] %vm339_vm2, %v419_v21 }
  0xdf   : > { %v556_v22 = vpop.f32.mrf.mxu0  ;;  %v575_v23 = vpop.f32.mrf.mxu1 }
  0xe0 PF: > { %s15_s18 = sadd.s32 1, %s592_s18  }
  0xe1   : > { %p12_p4 = scmp.ge.s32.totalorder %s15_s18, 4  }
  0xe3   :  { %14 = sbr.rel (!%p12_p4) target bundleno = 1 (0x1), region = 76 }

</bundles_post_ra>
